<compile_context>
chip_gen: v7x
topology: tpu7x:2x2x1
jax: 0.10.0
libtpu: 0.0.40
codegen_flags: <defaults>
</compile_context>

<pallas_src>
import jax
import jax.numpy as jnp
from jax.experimental import pallas as pl
from jax.experimental.pallas import tpu as pltpu


def _round_up(x, m):
    return ((x + m - 1) // m) * m


def _silu(x):
    return x * jax.nn.sigmoid(x)


# ----------------------------- kernel ---------------------------------------

def fusion_kernel(feat_ref, w_branch_ref, w_f1_ref, w_f2_ref, bias_ref,
                  out_ref):
    three_h, hidden = w_f1_ref.shape          # 3*H_pad, H_pad
    out_pad = out_ref.shape[-1]

    biases = bias_ref[...]                    # f32 [3, width]
    b_branch = biases[0:1, :three_h]          # b_ecg | b_text(BN folded) | b_tab
    b_f1 = biases[1:2, :hidden]
    b_f2 = biases[2:3, :out_pad]

    # All three branch projections in one lane-dense bf16 matmul against a
    # block-diagonal weight (mean-pool and BatchNorm already folded in).
    pre = jnp.dot(feat_ref[...], w_branch_ref[...],
                  preferred_element_type=jnp.float32)          # [B, 3*H_pad] f32
    emb = _silu(pre + b_branch)                                # f32 activation math

    # fusion_proj: Linear + SiLU + Linear (output lane-padded to 128).
    h = _silu(jnp.dot(emb.astype(jnp.bfloat16), w_f1_ref[...],
                      preferred_element_type=jnp.float32) + b_f1)
    logits = jnp.dot(h.astype(jnp.bfloat16), w_f2_ref[...],
                     preferred_element_type=jnp.float32) + b_f2
    out_ref[...] = logits.astype(out_ref.dtype)


# ----------------------------- wrapper ---------------------------------------

def survival_fusion_forward(features, fused, *, block_b=1024):
    """Runs the fusion head in a batch-gridded Pallas kernel.

    features : [B, K_pad] bf16  packed [ecg0 | ecg1 | text | tab] features
               (lane-padded to a multiple of 128; in production the backbone
               heads should emit this layout directly).
    fused    : params from prepare_fused_params()
    """
    B, k_pad = features.shape
    meta = fused["meta"]
    assert k_pad == meta["k_pad"], "features not packed with pack_features()"
    out_pad = meta["out_pad"]
    three_h_pad, h_pad = fused["w_f1"].shape

    # Batch tile: biggest useful tile, sublane-aligned (multiple of 8), and at
    # least 2 grid steps for large batches so both v7x TensorCores get work.
    if B <= block_b:
        blk = B
    else:
        blk = min(block_b, _round_up(pl.cdiv(B, 2), 8))
        blk = max(8, (blk // 8) * 8)
    grid = (pl.cdiv(B, blk),)

    # Explicit scoped-VMEM budget (v5e default is only 16 MiB).
    bytes_feat = 2 * blk * k_pad * 2                       # bf16, double-buffered
    bytes_out = 2 * blk * out_pad * 2
    bytes_w = 2 * sum(int(a.size) * a.dtype.itemsize
                      for a in (fused["w_branch"], fused["w_f1"],
                                fused["w_f2"], fused["bias"]))
    bytes_act = blk * (three_h_pad + h_pad + out_pad) * 4  # f32 intermediates
    vmem_limit = int(1.5 * (bytes_feat + bytes_out + bytes_w + bytes_act)) \
        + (4 << 20)
    vmem_limit = max(min(vmem_limit, 64 << 20), 16 << 20)

    def weight_spec(arr):
        return pl.BlockSpec(arr.shape, lambda i: (0, 0))   # resident across grid

    out = pl.pallas_call(
        fusion_kernel,
        out_shape=jax.ShapeDtypeStruct((B, out_pad), jnp.bfloat16),
        grid=grid,
        in_specs=[
            pl.BlockSpec((blk, k_pad), lambda i: (i, 0)),
            weight_spec(fused["w_branch"]),
            weight_spec(fused["w_f1"]),
            weight_spec(fused["w_f2"]),
            weight_spec(fused["bias"]),
        ],
        out_specs=pl.BlockSpec((blk, out_pad), lambda i: (i, 0)),
        compiler_params=pltpu.CompilerParams(
            dimension_semantics=("parallel",),
            vmem_limit_bytes=vmem_limit),
    )(features, fused["w_branch"], fused["w_f1"], fused["w_f2"], fused["bias"])

    return out[:, :meta["nbins"]].astype(jnp.float32)


# ----------------------- parameter construction ------------------------------

def _xavier_uniform(key, out_features, in_features):
    # Matches torch.nn.init.xavier_uniform_ on a [out, in] weight.
    limit = (6.0 / (in_features + out_features)) ** 0.5
    return jax.random.uniform(key, (out_features, in_features), jnp.float32,
                              -limit, limit)


def make_raw_params(key, *, ecg_feat_dim, text_dim, text_segment, tabnet_dim,
                    hidden_dim, num_label_bins):
    """Raw (module-layout) parameters, weights pre-transposed to [in, out].

    Biases / BN stats are made non-trivial (as after training) so the folding
    math is actually exercised by the correctness check; forward semantics are
    identical to the PyTorch module.
    """
    ecg_dim = 2 * ecg_feat_dim
    text_full = text_segment * text_dim
    ks = jax.random.split(key, 14)

    def small(k, n):
        return 0.05 * jax.random.normal(k, (n,), jnp.float32)

    return {
        "w_ecg": _xavier_uniform(ks[0], hidden_dim, ecg_dim).T,         # [2E, H]
        "b_ecg": small(ks[1], hidden_dim),
        "w_text": _xavier_uniform(ks[2], hidden_dim, text_full).T,      # [3Td, H]
        "b_text": small(ks[3], hidden_dim),
        "bn_gamma": 1.0 + 0.1 * jax.random.normal(ks[4], (hidden_dim,), jnp.float32),
        "bn_beta": small(ks[5], hidden_dim),
        "bn_mean": 0.1 * jax.random.normal(ks[6], (hidden_dim,), jnp.float32),
        "bn_var": jax.random.uniform(ks[7], (hidden_dim,), jnp.float32, 0.5, 1.5),
        "w_tab": _xavier_uniform(ks[8], hidden_dim, tabnet_dim).T,      # [Tn, H]
        "b_tab": small(ks[9], hidden_dim),
        "w_f1": _xavier_uniform(ks[10], hidden_dim, 3 * hidden_dim).T,  # [3H, H]
        "b_f1": small(ks[11], hidden_dim),
        "w_f2": _xavier_uniform(ks[12], num_label_bins, hidden_dim).T,  # [H, nb]
        "b_f2": small(ks[13], num_label_bins),
    }


def prepare_fused_params(raw, *, seq_len, ecg_feat_dim, text_dim, text_segment,
                         tabnet_dim, bn_eps=1e-5, lane=128,
                         compute_dtype=jnp.bfloat16):
    """Algebraic folding + lane padding, done once at prep time."""
    E, S = ecg_feat_dim, seq_len
    hidden = raw["w_f1"].shape[1]
    nbins = raw["w_f2"].shape[1]

    k_ecg = 2 * S * E
    k_text = text_segment * text_dim
    k_tab = tabnet_dim
    k_raw = k_ecg + k_text + k_tab
    k_pad = _round_up(k_raw, lane)
    h_pad = _round_up(hidden, lane)
    out_pad = _round_up(nbins, lane)
    three_h_pad = 3 * h_pad

    # Fold the seq-mean into the ECG projection weight:
    #   mean_s(x[:, s, :]) @ W  ==  x.reshape(B, S*E) @ (tile(W, (S, 1)) / S)
    w_e0, w_e1 = raw["w_ecg"][:E], raw["w_ecg"][E:]
    w_ecg = jnp.concatenate(
        [jnp.tile(w_e0, (S, 1)), jnp.tile(w_e1, (S, 1))], axis=0) / S  # [2SE, H]

    # Fold eval-mode BatchNorm1d (running stats) into the text projection.
    scale = raw["bn_gamma"] * jax.lax.rsqrt(raw["bn_var"] + bn_eps)
    w_text = raw["w_text"] * scale[None, :]
    b_text = (raw["b_text"] - raw["bn_mean"]) * scale + raw["bn_beta"]

    # Block-diagonal branch weight [K_pad, 3*H_pad]: the three projections
    # become one lane-dense matmul; zero rows/cols make the padding inert.
    w_branch = jnp.zeros((k_pad, three_h_pad), jnp.float32)
    w_branch = w_branch.at[:k_ecg, :hidden].set(w_ecg)
    w_branch = w_branch.at[k_ecg:k_ecg + k_text,
                           h_pad:h_pad + hidden].set(w_text)
    w_branch = w_branch.at[k_ecg + k_text:k_raw,
                           2 * h_pad:2 * h_pad + hidden].set(raw["w_tab"])

    # fusion_proj weights, lane-padded; rows are remapped to the padded
    # [ecg | text | tab] segment layout of the concatenated embedding.
    w_f1 = jnp.zeros((three_h_pad, h_pad), jnp.float32)
    w_f1 = w_f1.at[:hidden, :hidden].set(raw["w_f1"][:hidden])
    w_f1 = w_f1.at[h_pad:h_pad + hidden, :hidden].set(
        raw["w_f1"][hidden:2 * hidden])
    w_f1 = w_f1.at[2 * h_pad:2 * h_pad + hidden, :hidden].set(
        raw["w_f1"][2 * hidden:])
    w_f2 = jnp.zeros((h_pad, out_pad), jnp.float32)
    w_f2 = w_f2.at[:hidden, :nbins].set(raw["w_f2"])

    # All bias vectors packed into one small f32 VMEM input.
    width = max(three_h_pad, out_pad)
    bias = jnp.zeros((3, width), jnp.float32)
    bias = bias.at[0, :hidden].set(raw["b_ecg"])
    bias = bias.at[0, h_pad:h_pad + hidden].set(b_text)
    bias = bias.at[0, 2 * h_pad:2 * h_pad + hidden].set(raw["b_tab"])
    bias = bias.at[1, :hidden].set(raw["b_f1"])
    bias = bias.at[2, :nbins].set(raw["b_f2"])

    return {
        "w_branch": w_branch.astype(compute_dtype),   # [K_pad, 3*H_pad] bf16
        "w_f1": w_f1.astype(compute_dtype),           # [3*H_pad, H_pad]  bf16
        "w_f2": w_f2.astype(compute_dtype),           # [H_pad, out_pad]  bf16
        "bias": bias,                                  # [3, width]        f32
        "meta": dict(k_ecg=k_ecg, k_text=k_text, k_tab=k_tab, k_raw=k_raw,
                     k_pad=k_pad, h_pad=h_pad, out_pad=out_pad, nbins=nbins),
    }


def pack_features(ecg_enc0, ecg_enc1, text_feature, tabnet_feature, meta,
                  dtype=jnp.bfloat16):
    """Builds the single lane-dense [B, K_pad] feature tensor.

    TODO(synk): in production the backbone heads should emit this layout
    directly so no extra HBM round trip happens before the fusion kernel; this
    helper only exists because the backbones are synthetic here.
    """
    B = ecg_enc0.shape[0]
    feat = jnp.concatenate(
        [ecg_enc0.reshape(B, -1), ecg_enc1.reshape(B, -1),
         text_feature, tabnet_feature], axis=-1)
    pad = meta["k_pad"] - feat.shape[1]
    if pad:
        feat = jnp.pad(feat, ((0, 0), (0, pad)))
    return feat.astype(dtype)


# ----------------------------- reference (pure JAX) ---------------------------

def reference_forward(ecg_enc0, ecg_enc1, text_feature, tabnet_feature, p):
    silu = lambda x: x * jax.nn.sigmoid(x)
    e = jnp.concatenate([ecg_enc0.mean(axis=1), ecg_enc1.mean(axis=1)], axis=-1)
    ecg_emb = silu(e @ p["w_ecg"] + p["b_ecg"])
    t = text_feature @ p["w_text"] + p["b_text"]
    t = (t - p["bn_mean"]) * jax.lax.rsqrt(p["bn_var"] + 1e-5) * p["bn_gamma"] \
        + p["bn_beta"]
    text_emb = silu(t)
    tab_emb = silu(tabnet_feature @ p["w_tab"] + p["b_tab"])
    cat = jnp.concatenate([ecg_emb, text_emb, tab_emb], axis=-1)
    h = silu(cat @ p["w_f1"] + p["b_f1"])
    return h @ p["w_f2"] + p["b_f2"]


# ----------------------------------- main -------------------------------------

if __name__ == "__main__":
    # Small, module-consistent shapes.
    B = 8               # batch
    S = 8               # ECG encoder sequence length
    E = 16              # ecg_model.proj.in_features  -> ecg_dim = 2*E = 32
    TEXT_DIM = 32       # per-segment text dim
    TEXT_SEG = 3        # text_segment               -> text_dim = 96
    TEXT_SEQ = 8        # T5 sequence length (only CLS token is used)
    TAB_DIM = 32        # tabnet_dim
    HIDDEN = 32         # hidden_dim
    NBINS = 8           # num_label_bins

    key = jax.random.PRNGKey(0)
    k_par, k_e0, k_e1, k_txt, k_tab = jax.random.split(key, 5)

    raw = make_raw_params(
        k_par, ecg_feat_dim=E, text_dim=TEXT_DIM, text_segment=TEXT_SEG,
        tabnet_dim=TAB_DIM, hidden_dim=HIDDEN, num_label_bins=NBINS)
    fused = prepare_fused_params(
        raw, seq_len=S, ecg_feat_dim=E, text_dim=TEXT_DIM,
        text_segment=TEXT_SEG, tabnet_dim=TAB_DIM)

    # Synthetic backbone outputs (stand-ins for ecg_model / text_model / tabnet).
    ecg_enc0 = jax.random.normal(k_e0, (B, S, E), jnp.float32)
    ecg_enc1 = jax.random.normal(k_e1, (B, S, E), jnp.float32)
    # T5 last_hidden_state for B*TEXT_SEG flattened segments; take CLS token
    # and reshape to [B, TEXT_SEG*TEXT_DIM] (mirrors the view/reshape in the
    # PyTorch forward).
    t5_hidden = jax.random.normal(
        k_txt, (B * TEXT_SEG, TEXT_SEQ, TEXT_DIM), jnp.float32)
    text_feature = t5_hidden[:, 0, :].reshape(B, TEXT_SEG * TEXT_DIM)
    tabnet_feature = jax.random.normal(k_tab, (B, TAB_DIM), jnp.float32)

    features = pack_features(ecg_enc0, ecg_enc1, text_feature, tabnet_feature,
                             fused["meta"])

    logits = survival_fusion_forward(features, fused)
    logits = jax.block_until_ready(logits)

    ref = reference_forward(ecg_enc0, ecg_enc1, text_feature, tabnet_feature, raw)
    assert logits.shape == (B, NBINS)
    max_err = float(jnp.max(jnp.abs(logits - ref)))
    # bf16 inputs/weights with f32 accumulation: expect ~1e-2-level error.
    assert jnp.allclose(logits, ref, atol=5e-2, rtol=5e-2), \
        f"mismatch vs JAX reference (max abs err {max_err})"

    print("KERNEL_OK")
</pallas_src>

<mosaic_0001>
module attributes {stable_mosaic.version = 11 : i64} {
  func.func @fusion_kernel(%arg0: i32, %arg1: memref<8x384xbf16, #tpu.memory_space<vmem>>, %arg2: memref<384x384xbf16, #tpu.memory_space<vmem>>, %arg3: memref<384x128xbf16, #tpu.memory_space<vmem>>, %arg4: memref<128x128xbf16, #tpu.memory_space<vmem>>, %arg5: memref<3x384xf32, #tpu.memory_space<vmem>>, %arg6: memref<8x128xbf16, #tpu.memory_space<vmem>>) attributes {dimension_semantics = [#tpu.dimension_semantics<parallel>], iteration_bounds = array<i64: 1>, scalar_prefetch = 0 : i64, scratch_operands = 0 : i64, tpu.core_type = #tpu.core_type<tc>, window_params = [{transform_indices = @transform_0, window_bounds = array<i64: 8, 384>}, {pipeline_mode = #tpu.pipeline_mode<synchronous>, transform_indices = @transform_1, window_bounds = array<i64: 384, 384>}, {pipeline_mode = #tpu.pipeline_mode<synchronous>, transform_indices = @transform_2, window_bounds = array<i64: 384, 128>}, {pipeline_mode = #tpu.pipeline_mode<synchronous>, transform_indices = @transform_3, window_bounds = array<i64: 128, 128>}, {pipeline_mode = #tpu.pipeline_mode<synchronous>, transform_indices = @transform_4, window_bounds = array<i64: 3, 384>}, {transform_indices = @transform_5, window_bounds = array<i64: 8, 128>}]} {
    %c0 = arith.constant 0 : index
    %c0_0 = arith.constant 0 : index
    %0 = vector.load %arg5[%c0, %c0_0] : memref<3x384xf32, #tpu.memory_space<vmem>>, vector<3x384xf32>
    %1 = vector.extract_strided_slice %0 {offsets = [0, 0], sizes = [1, 384], strides = [1, 1]} : vector<3x384xf32> to vector<1x384xf32>
    %2 = vector.extract_strided_slice %0 {offsets = [1, 0], sizes = [1, 128], strides = [1, 1]} : vector<3x384xf32> to vector<1x128xf32>
    %3 = vector.extract_strided_slice %0 {offsets = [2, 0], sizes = [1, 128], strides = [1, 1]} : vector<3x384xf32> to vector<1x128xf32>
    %c0_1 = arith.constant 0 : index
    %c0_2 = arith.constant 0 : index
    %4 = vector.load %arg1[%c0_1, %c0_2] : memref<8x384xbf16, #tpu.memory_space<vmem>>, vector<8x384xbf16>
    %c0_3 = arith.constant 0 : index
    %c0_4 = arith.constant 0 : index
    %5 = vector.load %arg2[%c0_3, %c0_4] : memref<384x384xbf16, #tpu.memory_space<vmem>>, vector<384x384xbf16>
    %cst = arith.constant dense<0.000000e+00> : vector<8x384xf32>
    %6 = tpu.matmul %4, %5, %cst {dimension_numbers = #tpu.dot_dimension_numbers<[1], [0], [0], [1], [0, 0, 1, 1], [], []>} : vector<8x384xbf16>, vector<384x384xbf16>, vector<8x384xf32> -> vector<8x384xf32>
    %7 = vector.broadcast %1 : vector<1x384xf32> to vector<8x384xf32>
    %8 = arith.addf %6, %7 : vector<8x384xf32>
    %9 = arith.negf %8 : vector<8x384xf32>
    %10 = math.exp %9 : vector<8x384xf32>
    %cst_5 = arith.constant 1.000000e+00 : f32
    %11 = vector.broadcast %cst_5 : f32 to vector<8x384xf32>
    %12 = arith.addf %11, %10 : vector<8x384xf32>
    %13 = arith.divf %11, %12 : vector<8x384xf32>
    %14 = arith.mulf %8, %13 : vector<8x384xf32>
    %15 = arith.truncf %14 : vector<8x384xf32> to vector<8x384xbf16>
    %c0_6 = arith.constant 0 : index
    %c0_7 = arith.constant 0 : index
    %16 = vector.load %arg3[%c0_6, %c0_7] : memref<384x128xbf16, #tpu.memory_space<vmem>>, vector<384x128xbf16>
    %cst_8 = arith.constant dense<0.000000e+00> : vector<8x128xf32>
    %17 = tpu.matmul %15, %16, %cst_8 {dimension_numbers = #tpu.dot_dimension_numbers<[1], [0], [0], [1], [0, 0, 1, 1], [], []>} : vector<8x384xbf16>, vector<384x128xbf16>, vector<8x128xf32> -> vector<8x128xf32>
    %18 = vector.broadcast %2 : vector<1x128xf32> to vector<8x128xf32>
    %19 = arith.addf %17, %18 : vector<8x128xf32>
    %20 = arith.negf %19 : vector<8x128xf32>
    %21 = math.exp %20 : vector<8x128xf32>
    %cst_9 = arith.constant 1.000000e+00 : f32
    %22 = vector.broadcast %cst_9 : f32 to vector<8x128xf32>
    %23 = arith.addf %22, %21 : vector<8x128xf32>
    %24 = arith.divf %22, %23 : vector<8x128xf32>
    %25 = arith.mulf %19, %24 : vector<8x128xf32>
    %26 = arith.truncf %25 : vector<8x128xf32> to vector<8x128xbf16>
    %c0_10 = arith.constant 0 : index
    %c0_11 = arith.constant 0 : index
    %27 = vector.load %arg4[%c0_10, %c0_11] : memref<128x128xbf16, #tpu.memory_space<vmem>>, vector<128x128xbf16>
    %cst_12 = arith.constant dense<0.000000e+00> : vector<8x128xf32>
    %28 = tpu.matmul %26, %27, %cst_12 {dimension_numbers = #tpu.dot_dimension_numbers<[1], [0], [0], [1], [0, 0, 1, 1], [], []>} : vector<8x128xbf16>, vector<128x128xbf16>, vector<8x128xf32> -> vector<8x128xf32>
    %29 = vector.broadcast %3 : vector<1x128xf32> to vector<8x128xf32>
    %30 = arith.addf %28, %29 : vector<8x128xf32>
    %31 = arith.truncf %30 : vector<8x128xf32> to vector<8x128xbf16>
    %c0_13 = arith.constant 0 : index
    %c0_14 = arith.constant 0 : index
    %32 = vector.load %arg6[%c0_13, %c0_14] : memref<8x128xbf16, #tpu.memory_space<vmem>>, vector<8x128xbf16>
    tpu.vector_store %arg6[%c0_13, %c0_14], %31 {strides = array<i32>} : memref<8x128xbf16, #tpu.memory_space<vmem>>, vector<8x128xbf16>,
    return
  }
  func.func @transform_0(%arg0: i32) -> (i32, i32) {
    %c0_i32 = arith.constant 0 : i32
    %c0_i32_0 = arith.constant 0 : i32
    return %arg0, %c0_i32 : i32, i32
  }
  func.func @transform_1(%arg0: i32) -> (i32, i32) {
    %c0_i32 = arith.constant 0 : i32
    %c0_i32_0 = arith.constant 0 : i32
    %c0_i32_1 = arith.constant 0 : i32
    return %c0_i32, %c0_i32_0 : i32, i32
  }
  func.func @transform_2(%arg0: i32) -> (i32, i32) {
    %c0_i32 = arith.constant 0 : i32
    %c0_i32_0 = arith.constant 0 : i32
    %c0_i32_1 = arith.constant 0 : i32
    return %c0_i32, %c0_i32_0 : i32, i32
  }
  func.func @transform_3(%arg0: i32) -> (i32, i32) {
    %c0_i32 = arith.constant 0 : i32
    %c0_i32_0 = arith.constant 0 : i32
    %c0_i32_1 = arith.constant 0 : i32
    return %c0_i32, %c0_i32_0 : i32, i32
  }
  func.func @transform_4(%arg0: i32) -> (i32, i32) {
    %c0_i32 = arith.constant 0 : i32
    %c0_i32_0 = arith.constant 0 : i32
    %c0_i32_1 = arith.constant 0 : i32
    return %c0_i32, %c0_i32_0 : i32, i32
  }
  func.func @transform_5(%arg0: i32) -> (i32, i32) {
    %c0_i32 = arith.constant 0 : i32
    %c0_i32_0 = arith.constant 0 : i32
    return %arg0, %c0_i32 : i32, i32
  }
}

</mosaic_0001>

<bundles_post_ra>
// kernel: tpu_custom_call.1
= control target key start
LH: loop header
LB: loop body
LE: loop exit
PB: predicated region body
PF: predicated region fallthrough
CT: control target
= control target key end

     0   :  { %10 = vsyncpa [#allocation3], 0  ;;  %s1875_s0 = inlined_call_operand.hbm [shape: bf16[8,384], index: 0, kind: input, shape index: {}]   ;;  %s1876_s1 = inlined_call_operand.hbm [shape: bf16[384,384], index: 1, kind: input, shape index: {}]   ;;  %s1877_s2 = inlined_call_operand.hbm [shape: bf16[384,128], index: 2, kind: input, shape index: {}]   ;;  %s1878_s3 = inlined_call_operand.hbm [shape: bf16[128,128], index: 3, kind: input, shape index: {}]   ;;  %s1879_s4 = inlined_call_operand.vmem [shape: f32[3,384], index: 4, kind: input, shape index: {}]   ;;  %s1880_s5 = inlined_call_operand.hbm [shape: bf16[8,128], index: 5, kind: output, shape index: {}]  }
   0x1   :  { %11 = vsyncpa [#allocation6], 0 }
   0x2   :  { %12 = vsyncpa [#allocation9], 0 }
   0x3   :  { %13 = vsyncpa [#allocation4], 0  ;;  %s1721_s18 = smov [#allocation5]   ;;  %s1603_s22 = scalar_lea.hbm %s1876_s1, 9216 }
   0x4   :  { %s29_s19 = sshll.u32 %s1721_s18, 4  ;;  %p1604_p0 = scmp.ne.s32.totalorder %s1876_s1, %s1603_s22  ;;  %s30_s19 = int_to_ptr.vmem [resolvable:$true] %s29_s19 }
   0x5   :  { %p1607_p1 = scmp.lt.u32.totalorder %s1603_s22, %s1876_s1 }
   0x7   :  { %p1609_p2 = pnand %p1607_p1, %p1604_p0 }
   0x9   :  { %1612 = shalt.err (!%p1609_p2)
}
   0xa   :  { %s1613_s27 = scalar_lea.vmem %s30_s19, 9216  ;;  %p1618_p4 = scmp.lt.s32.totalorder %s30_s19, %s30_s19 }
   0xb   :  { %p1614_p3 = scmp.ne.s32.totalorder %s30_s19, %s1613_s27  ;;  %p1619_p5 = scmp.lt.s32.totalorder %s1613_s27, %s1613_s27 }
   0xd   :  { %p1620_p6 = por %p1619_p5, %p1618_p4 }
   0xf   :  { %p1621_p7 = pnand %p1620_p6, %p1614_p3 }
  0x11   :  { %1624 = shalt.err (!%p1621_p7)
}
  0x12   :  { %s1722_s28 = smov 192   ;;  %s1723_s29 = smov 12  }
  0x13   :  { %35 = dma.hbm_to_vmem [thread:$0]  %s1876_s1, 9216, %s30_s19, [#allocation6], %s1722_s28, %s1722_s28, %s1723_s29  }
  0x14   :  { %s1724_s7 = smov [#allocation2]   ;;  %s1725_s9 = smov [#allocation7]  }
  0x15   :  { %s20_s8 = sshll.u32 %s1724_s7, 4  ;;  %s41_s10 = sshll.u32 %s1725_s9, 4  ;;  %s21_s8 = int_to_ptr.vmem [resolvable:$true] %s20_s8  ;;  %s42_s10 = int_to_ptr.vmem [resolvable:$true] %s41_s10 }
  0x16   :  { %s1625_s13 = scalar_lea.hbm %s1875_s0, 192 }
  0x17   :  { %p1626_p8 = scmp.ne.s32.totalorder %s1875_s0, %s1625_s13  ;;  %p1629_p9 = scmp.lt.u32.totalorder %s1625_s13, %s1875_s0 }
  0x19   :  { %p1631_p10 = pnand %p1629_p9, %p1626_p8 }
  0x1b   :  { %1634 = shalt.err (!%p1631_p10)
}
  0x1c   :  { %s1635_s1 = scalar_lea.vmem %s21_s8, 192  ;;  %p1640_p12 = scmp.lt.s32.totalorder %s21_s8, %s21_s8 }
  0x1d   :  { %p1636_p11 = scmp.ne.s32.totalorder %s21_s8, %s1635_s1  ;;  %p1641_p13 = scmp.lt.s32.totalorder %s1635_s1, %s1635_s1 }
  0x1f   :  { %p1642_p0 = por %p1641_p13, %p1640_p12 }
  0x21   :  { %p1643_p1 = pnand %p1642_p0, %p1636_p11 }
  0x23   :  { %1646 = shalt.err (!%p1643_p1)
}
  0x24   :  { %23 = dma.hbm_to_vmem [thread:$0]  %s1875_s0, 192, %s21_s8, [#allocation3]  }
  0x25   :  { %s1647_s22 = scalar_lea.hbm %s1877_s2, 3072 }
  0x26   :  { %p1648_p2 = scmp.ne.s32.totalorder %s1877_s2, %s1647_s22  ;;  %p1651_p3 = scmp.lt.u32.totalorder %s1647_s22, %s1877_s2 }
  0x28   :  { %p1653_p4 = pnand %p1651_p3, %p1648_p2 }
  0x2a   :  { %1656 = shalt.err (!%p1653_p4)
}
  0x2b   :  { %s1657_s27 = scalar_lea.vmem %s42_s10, 3072  ;;  %p1662_p6 = scmp.lt.s32.totalorder %s42_s10, %s42_s10 }
  0x2c   :  { %p1658_p5 = scmp.ne.s32.totalorder %s42_s10, %s1657_s27  ;;  %p1663_p7 = scmp.lt.s32.totalorder %s1657_s27, %s1657_s27 }
  0x2e   :  { %p1664_p8 = por %p1663_p7, %p1662_p6 }
  0x30   :  { %p1665_p9 = pnand %p1664_p8, %p1658_p5 }
  0x32   :  { %1668 = shalt.err (!%p1665_p9)
}
  0x33   :  { %s1726_s0 = smov 64   ;;  %s1727_s28 = smov 4  }
  0x34   :  { %47 = dma.hbm_to_vmem [thread:$0]  %s1877_s2, 3072, %s42_s10, [#allocation6], %s1726_s0, %s1726_s0, %s1727_s28  }
  0x35   :  { %s1728_s6 = smov [#allocation8]   ;;  %s1669_s11 = scalar_lea.hbm %s1878_s3, 1024 }
  0x36   :  { %s53_s7 = sshll.u32 %s1728_s6, 4  ;;  %p1670_p10 = scmp.ne.s32.totalorder %s1878_s3, %s1669_s11  ;;  %s54_s7 = int_to_ptr.vmem [resolvable:$true] %s53_s7 }
  0x37   :  { %p1673_p11 = scmp.lt.u32.totalorder %s1669_s11, %s1878_s3 }
  0x39   :  { %p1675_p12 = pnand %p1673_p11, %p1670_p10 }
  0x3b   :  { %1678 = shalt.err (!%p1675_p12)
}
  0x3c   :  { %s1679_s16 = scalar_lea.vmem %s54_s7, 1024  ;;  %p1684_p0 = scmp.lt.s32.totalorder %s54_s7, %s54_s7 }
  0x3d   :  { %p1680_p13 = scmp.ne.s32.totalorder %s54_s7, %s1679_s16  ;;  %p1685_p1 = scmp.lt.s32.totalorder %s1679_s16, %s1679_s16 }
  0x3f   :  { %p1686_p2 = por %p1685_p1, %p1684_p0 }
  0x41   :  { %p1687_p3 = pnand %p1686_p2, %p1680_p13 }
  0x43   :  { %1690 = shalt.err (!%p1687_p3)
}
  0x44   :  { %59 = dma.hbm_to_vmem [thread:$0]  %s1878_s3, 1024, %s54_s7, [#allocation9], %s1726_s0, %s1726_s0, %s1727_s28  }
  0x45   :  { %1713 = dma.done.wait [#allocation3], 192  }
  0x46   :  { %1714 = vsyncadd [#allocation3], 4294967104 }
  0x47   :  { %1715 = dma.done.wait [#allocation6], 12288  }
  0x48   :  { %1716 = vsyncadd [#allocation6], 4294955008 }
  0x49   :  { %1717 = dma.done.wait [#allocation9], 1024  }
  0x4a   :  { %1718 = vsyncadd [#allocation9], 4294966272  ;;  %v1456_v0 = vld [vmem:[#allocation5 + $0x4] ss:$12 sps:$4 sm:$0xff]   ;;  %v1458_v1 = vld [vmem:[#allocation5 + $0xc8] ss:$12 sps:$4 sm:$0xff]  }
  0x4b   :  { %599 = vmatprep.subr.bf16.mxu0 %v1456_v0  ;;  %v1459_v2 = vld [vmem:[#allocation5] ss:$12 sps:$4 sm:$0xff]   ;;  %1307 = vmatprep.subr.bf16.mxu1 %v1458_v1  ;;  %v1460_v3 = vld [vmem:[#allocation5 + $0x8] ss:$12 sps:$4 sm:$0xff]   ;;  %v1464_v6 = vld [vmem:[#allocation5 + $0x18] ss:$12 sps:$4 sm:$0xff]  }
  0x4c   :  { %600 = vmatpush1.bf16.msra.mxu0 %v1459_v2  ;;  %v1461_v4 = vld [vmem:[#allocation5 + $0x1c] ss:$12 sps:$4 sm:$0xff]   ;;  %1308 = vmatpush3.bf16.msra.mxu1 %v1460_v3  ;;  %v1463_v5 = vld [vmem:[#allocation5 + $0xe0] ss:$12 sps:$4 sm:$0xff]   ;;  %v1468_v9 = vld [vmem:[#allocation5 + $0xf8] ss:$12 sps:$4 sm:$0xff]  }
  0x4d   :  { %601 = vmatprep.subr.bf16.mxu0 %v1461_v4  ;;  %v1465_v7 = vld [vmem:[#allocation5 + $0x20] ss:$12 sps:$4 sm:$0xff]   ;;  %1309 = vmatprep.subr.bf16.mxu1 %v1463_v5  ;;  %v1469_v10 = vld [vmem:[#allocation5 + $0x30] ss:$12 sps:$4 sm:$0xff]   ;;  %v1470_v11 = vld [vmem:[#allocation5 + $0x38] ss:$12 sps:$4 sm:$0xff]  }
  0x4e   :  { %v1466_v8 = vld [vmem:[#allocation5 + $0x34] ss:$12 sps:$4 sm:$0xff]   ;;  %v1471_v12 = vld [vmem:[#allocation5 + $0x4c] ss:$12 sps:$4 sm:$0xff]   ;;  %v1473_v13 = vld [vmem:[#allocation5 + $0x110] ss:$12 sps:$4 sm:$0xff]  }
  0x4f   :  { %v1474_v14 = vld [vmem:[#allocation5 + $0x48] ss:$12 sps:$4 sm:$0xff]   ;;  %v1475_v15 = vld [vmem:[#allocation5 + $0x50] ss:$12 sps:$4 sm:$0xff]   ;;  %v1479_v18 = vld [vmem:[#allocation5 + $0x60] ss:$12 sps:$4 sm:$0xff]  }
  0x50   :  { %602 = vmatpush1.bf16.msra.mxu0 %v1464_v6  ;;  %1310 = vmatpush3.bf16.msra.mxu1 %v1465_v7  ;;  %v1476_v16 = vld [vmem:[#allocation5 + $0x64] ss:$12 sps:$4 sm:$0xff]   ;;  %v1478_v17 = vld [vmem:[#allocation5 + $0x128] ss:$12 sps:$4 sm:$0xff]   ;;  %v1483_v21 = vld [vmem:[#allocation5 + $0x140] ss:$12 sps:$4 sm:$0xff]  }
  0x51   :  { %603 = vmatprep.subr.bf16.mxu0 %v1466_v8  ;;  %1311 = vmatprep.subr.bf16.mxu1 %v1468_v9  ;;  %v1480_v19 = vld [vmem:[#allocation5 + $0x68] ss:$12 sps:$4 sm:$0xff]   ;;  %v1484_v22 = vld [vmem:[#allocation5 + $0x78] ss:$12 sps:$4 sm:$0xff]   ;;  %v1485_v23 = vld [vmem:[#allocation5 + $0x80] ss:$12 sps:$4 sm:$0xff]  }
  0x52   :  { %v1481_v20 = vld [vmem:[#allocation5 + $0x7c] ss:$12 sps:$4 sm:$0xff]   ;;  %v1486_v24 = vld [vmem:[#allocation5 + $0x94] ss:$12 sps:$4 sm:$0xff]   ;;  %v1488_v25 = vld [vmem:[#allocation5 + $0x158] ss:$12 sps:$4 sm:$0xff]  }
  0x53   :  { %v1489_v26 = vld [vmem:[#allocation5 + $0x90] ss:$12 sps:$4 sm:$0xff]   ;;  %v1490_v27 = vld [vmem:[#allocation5 + $0x98] ss:$12 sps:$4 sm:$0xff]   ;;  %v1494_v30 = vld [vmem:[#allocation5 + $0xa8] ss:$12 sps:$4 sm:$0xff]  }
  0x54   :  { %604 = vmatpush1.bf16.msra.mxu0 %v1469_v10  ;;  %1312 = vmatpush3.bf16.msra.mxu1 %v1470_v11  ;;  %v1491_v28 = vld [vmem:[#allocation5 + $0xac] ss:$12 sps:$4 sm:$0xff]   ;;  %v1493_v29 = vld [vmem:[#allocation5 + $0x170] ss:$12 sps:$4 sm:$0xff]   ;;  %v1501_v37 = vld [vmem:[#allocation5 + $0x188] ss:$12 sps:$4 sm:$0xff]  }
  0x55   :  { %605 = vmatprep.subr.bf16.mxu0 %v1471_v12  ;;  %1313 = vmatprep.subr.bf16.mxu1 %v1473_v13  ;;  %v77_v31 = vld [vmem:[#allocation2] sm:$0xff]  ;;  %v1495_v32 = vld [vmem:[#allocation5 + $0xb0] ss:$12 sps:$4 sm:$0xff]   ;;  %v1500_v36 = vld [vmem:[#allocation5 + $0xc0] ss:$12 sps:$4 sm:$0xff]   ;;  %v1729_v39 = vmov 0.0  }
  0x56   :  { %v1197_v33 = vcombine.high %v77_v31, %v77_v31  ;;  %v1496_v34 = vld [vmem:[#allocation5 + $0xc4] ss:$12 sps:$4 sm:$0xff]   ;;  %v1811_v35 = vcombine.low %v77_v31, %v77_v31  ;;  %v1502_v38 = vld [vmem:[#allocation5 + $0xdc] ss:$12 sps:$4 sm:$0xff]   ;;  %v1505_v41 = vld [vmem:[#allocation5 + $0x1a0] ss:$12 sps:$4 sm:$0xff]  }
  0x57   :  { %v1504_v40 = vld [vmem:[#allocation5 + $0xd8] ss:$12 sps:$4 sm:$0xff]   ;;  %v1506_v42 = vld [vmem:[#allocation5 + $0xf4] ss:$12 sps:$4 sm:$0xff]   ;;  %vm1730_vm0 = vmmov 0   ;;  %v1731_v2 = vmov 0  }
  0x58   :  { %606 = vmatpush1.bf16.msra.mxu0 %v1474_v14  ;;  %1314 = vmatpush3.bf16.msra.mxu1 %v1475_v15  ;;  %v1508_v43 = vld [vmem:[#allocation5 + $0xf0] ss:$12 sps:$4 sm:$0xff]   ;;  %v1509_v44 = vld [vmem:[#allocation5 + $0x1b8] ss:$12 sps:$4 sm:$0xff]   ;;  %v1512_v46 = vld [vmem:[#allocation5 + $0x108] ss:$12 sps:$4 sm:$0xff]  }
  0x59   :  { %607 = vmatprep.subr.bf16.mxu0 %v1476_v16  ;;  %1315 = vmatprep.subr.bf16.mxu1 %v1478_v17  ;;  %v1510_v45 = vld [vmem:[#allocation5 + $0x10c] ss:$12 sps:$4 sm:$0xff]   ;;  %v1513_v47 = vld [vmem:[#allocation5 + $0x1d0] ss:$12 sps:$4 sm:$0xff]   ;;  %v1517_v50 = vld [vmem:[#allocation5 + $0x1e8] ss:$12 sps:$4 sm:$0xff]  }
  0x5a   :  { %713 = vmatprep.mubr.bf16.mxu1 %v1197_v33  ;;  %631 = vmatprep.mubr.bf16.mxu0 %v1197_v33  ;;  %v1514_v48 = vld [vmem:[#allocation5 + $0x124] ss:$12 sps:$4 sm:$0xff]   ;;  %v1516_v49 = vld [vmem:[#allocation5 + $0x120] ss:$12 sps:$4 sm:$0xff]   ;;  %v1518_v51 = vld [vmem:[#allocation5 + $0x13c] ss:$12 sps:$4 sm:$0xff]  }
  0x5b   :  { %v1520_v52 = vld [vmem:[#allocation5 + $0x138] ss:$12 sps:$4 sm:$0xff]   ;;  %v1521_v53 = vld [vmem:[#allocation5 + $0x200] ss:$12 sps:$4 sm:$0xff]   ;;  %v1524_v55 = vld [vmem:[#allocation5 + $0x150] ss:$12 sps:$4 sm:$0xff]  }
  0x5c   :  { %608 = vmatpush1.bf16.msra.mxu0 %v1479_v18  ;;  %1316 = vmatpush3.bf16.msra.mxu1 %v1480_v19  ;;  %v1522_v54 = vld [vmem:[#allocation5 + $0x154] ss:$12 sps:$4 sm:$0xff]   ;;  %v1525_v56 = vld [vmem:[#allocation5 + $0x218] ss:$12 sps:$4 sm:$0xff]   ;;  %v1529_v59 = vld [vmem:[#allocation5 + $0x230] ss:$12 sps:$4 sm:$0xff]  }
  0x5d   :  { %609 = vmatprep.subr.bf16.mxu0 %v1481_v20  ;;  %1317 = vmatprep.subr.bf16.mxu1 %v1483_v21  ;;  %v1526_v57 = vld [vmem:[#allocation5 + $0x16c] ss:$12 sps:$4 sm:$0xff]   ;;  %v1528_v58 = vld [vmem:[#allocation5 + $0x168] ss:$12 sps:$4 sm:$0xff]   ;;  %v1532_v60 = vld [vmem:[#allocation5 + $0x184] ss:$12 sps:$4 sm:$0xff]  }
  0x5e   :  { %v1530_v61 = vld [vmem:[#allocation5 + $0x180] ss:$12 sps:$4 sm:$0xff]   ;;  %v1533_v62 = vld [vmem:[#allocation2 + $0x8] ss:$0 sps:$4 sm:$0xff]   ;;  %v1534_v0 = vld [vmem:[#allocation5 + $0x198] ss:$12 sps:$4 sm:$0xff]  }
  0x5f   :  { %v1536_v63 = vld [vmem:[#allocation5 + $0x19c] ss:$12 sps:$4 sm:$0xff]   ;;  %v1539_v1 = vld [vmem:[#allocation5 + $0x1b4] ss:$12 sps:$4 sm:$0xff]   ;;  %v1542_v4 = vld [vmem:[#allocation5 + $0x1cc] ss:$12 sps:$4 sm:$0xff]  }
  0x60   :  { %610 = vmatpush1.bf16.msra.mxu0 %v1484_v22  ;;  %1318 = vmatpush3.bf16.msra.mxu1 %v1485_v23  ;;  %v1537_v3 = vld [vmem:[#allocation5 + $0x1b0] ss:$12 sps:$4 sm:$0xff]   ;;  %v1540_v5 = vld [vmem:[#allocation5 + $0x1c8] ss:$12 sps:$4 sm:$0xff]   ;;  %v1543_v7 = vld [vmem:[#allocation5 + $0x1e0] ss:$12 sps:$4 sm:$0xff]  }
  0x61   :  { %611 = vmatprep.subr.bf16.mxu0 %v1486_v24  ;;  %1319 = vmatprep.subr.bf16.mxu1 %v1488_v25  ;;  %v1545_v6 = vld [vmem:[#allocation5 + $0x1e4] ss:$12 sps:$4 sm:$0xff]   ;;  %v1548_v8 = vld [vmem:[#allocation5 + $0x1fc] ss:$12 sps:$4 sm:$0xff]   ;;  %v1551_v10 = vld [vmem:[#allocation5 + $0x214] ss:$12 sps:$4 sm:$0xff]  }
  0x62   :  { %v1546_v9 = vld [vmem:[#allocation5 + $0x1f8] ss:$12 sps:$4 sm:$0xff]   ;;  %v1549_v11 = vld [vmem:[#allocation5 + $0x210] ss:$12 sps:$4 sm:$0xff]   ;;  %v1552_v13 = vld [vmem:[#allocation5 + $0x228] ss:$12 sps:$4 sm:$0xff]  }
  0x63   :  { %v1554_v12 = vld [vmem:[#allocation5 + $0x22c] ss:$12 sps:$4 sm:$0xff]   ;;  %v1555_v14 = vld [vmem:[#allocation7 + $0x80] sm:$0xff]   ;;  %v1557_v16 = vld [vmem:[#allocation7 + $0x90] sm:$0xff]  }
  0x64   :  { %612 = vmatpush1.bf16.msra.mxu0 %v1489_v26  ;;  %1320 = vmatpush3.bf16.msra.mxu1 %v1490_v27  ;;  %v1556_v15 = vld [vmem:[#allocation7 + $0x88] sm:$0xff]   ;;  %v1558_v17 = vld [vmem:[#allocation7 + $0x98] sm:$0xff]   ;;  %v1559_v18 = vld [vmem:[#allocation7 + $0xa0] sm:$0xff]  }
  0x65   :  { %613 = vmatprep.subr.bf16.mxu0 %v1491_v28  ;;  %1321 = vmatprep.subr.bf16.mxu1 %v1493_v29  ;;  %v1560_v19 = vld [vmem:[#allocation7 + $0xa8] sm:$0xff]   ;;  %v1561_v20 = vld [vmem:[#allocation7 + $0xb0] sm:$0xff]   ;;  %v1562_v21 = vld [vmem:[#allocation7 + $0xb8] sm:$0xff]  }
  0x66   :  { %v1563_v22 = vld [vmem:[#allocation7 + $0x40] sm:$0xff]   ;;  %v1565_v24 = vld [vmem:[#allocation7 + $0x48] sm:$0xff]   ;;  %v1567_v26 = vld [vmem:[#allocation7 + $0x50] sm:$0xff]  }
  0x67   :  { %v1564_v23 = vld [vmem:[#allocation7] sm:$0xff]   ;;  %v1566_v25 = vld [vmem:[#allocation7 + $0x8] sm:$0xff]   ;;  %v1568_v27 = vld [vmem:[#allocation7 + $0x10] sm:$0xff]  }
  0x68   :  { %614 = vmatpush1.bf16.msra.mxu0 %v1494_v30  ;;  %1322 = vmatpush3.bf16.msra.mxu1 %v1495_v32  ;;  %v1569_v28 = vld [vmem:[#allocation7 + $0x58] sm:$0xff]   ;;  %v1571_v30 = vld [vmem:[#allocation7 + $0x60] sm:$0xff]   ;;  %v1573_v32 = vld [vmem:[#allocation7 + $0x68] sm:$0xff]  }
  0x69   :  { %615 = vmatprep.subr.bf16.mxu0 %v1496_v34  ;;  %1378 = vmatprep.subr.bf16.mxu1 %v1729_v39  ;;  %v1570_v29 = vld [vmem:[#allocation7 + $0x18] sm:$0xff]   ;;  %v1572_v31 = vld [vmem:[#allocation7 + $0x20] sm:$0xff]   ;;  %v1574_v33 = vld [vmem:[#allocation7 + $0x28] sm:$0xff]  }
  0x6a   :  { %v1575_v34 = vld [vmem:[#allocation7 + $0x70] sm:$0xff]  }
  0x6b   :  { %714 = vmatmul.mubr.bf16.vlgmr.msra.gmra.mrb[0].mxu1 %v1811_v35 }
  0x6c   :  { %616 = vmatpush1.bf16.msra.mxu0 %v1500_v36  ;;  %1379 = vmatpush3.bf16.msra.mxu1 %v1501_v37  ;;  %v1577_v36 = vld [vmem:[#allocation7 + $0x78] sm:$0xff]  }
  0x6d   :  { %617 = vmatprep.subr.bf16.mxu0 %v1502_v38  ;;  %1380 = vmatprep.subr.bf16.mxu1 %v1729_v39  ;;  %v1578_v37 = vld [vmem:[#allocation7 + $0x38] sm:$0xff]  }
  0x6e   :  { %1394 = vmatprep.mubr.msk.bf16.mxu1 %vm1730_vm0, %v1729_v39 }
  0x70   :  { %618 = vmatpush1.bf16.msra.mxu0 %v1504_v40  ;;  %1381 = vmatpush3.bf16.msra.mxu1 %v1505_v41 }
  0x71   :  { %619 = vmatprep.subr.bf16.mxu0 %v1506_v42  ;;  %1382 = vmatprep.subr.bf16.mxu1 %v1729_v39 }
  0x74   :  { %620 = vmatpush1.bf16.msra.mxu0 %v1508_v43  ;;  %1383 = vmatpush3.bf16.msra.mxu1 %v1509_v44  ;;  %v177_v44 = vlaneseq }
  0x75   :  { %621 = vmatprep.subr.bf16.mxu0 %v1510_v45  ;;  %1384 = vmatprep.subr.bf16.mxu1 %v1729_v39 }
  0x76   :  { %v1836_v45 = vshrl.u32 %v177_v44, 7 }
  0x78   :  { %622 = vmatpush1.bf16.msra.mxu0 %v1512_v46  ;;  %1385 = vmatpush3.bf16.msra.mxu1 %v1513_v47  ;;  %v179_v46 = vsub.s32 0, %v1836_v45  ;;  %v76_v47 = vld [vmem:[%s1879_s4 + $0x8] sm:$0x7] }
  0x79   :  { %623 = vmatprep.subr.bf16.mxu0 %v1514_v48  ;;  %1386 = vmatprep.subr.bf16.mxu1 %v1729_v39 }
  0x7a   :  { %v188_v48 = vrot.slane %v76_v47, %v179_v46 }
  0x7c   :  { %624 = vmatpush1.bf16.msra.mxu0 %v1516_v49  ;;  %1387 = vmatpush3.bf16.msra.mxu1 %v1517_v50  ;;  %v203_v49 = vrot.slane %v188_v48, %v179_v46 }
  0x7d   :  { %625 = vmatprep.subr.bf16.mxu0 %v1518_v51  ;;  %1388 = vmatprep.subr.bf16.mxu1 %v1729_v39 }
  0x80   :  { %626 = vmatpush1.bf16.msra.mxu0 %v1520_v52  ;;  %1389 = vmatpush3.bf16.msra.mxu1 %v1521_v53 }
  0x81   :  { %627 = vmatprep.subr.bf16.mxu0 %v1522_v54  ;;  %1390 = vmatprep.subr.bf16.mxu1 %v1729_v39 }
  0x84   :  { %628 = vmatpush1.bf16.msra.mxu0 %v1524_v55  ;;  %1391 = vmatpush3.bf16.msra.mxu1 %v1525_v56 }
  0x85   :  { %629 = vmatprep.subr.bf16.mxu0 %v1526_v57  ;;  %1392 = vmatprep.subr.bf16.mxu1 %v1729_v39 }
  0x88   :  { %630 = vmatpush1.bf16.msra.mxu0 %v1528_v58  ;;  %1393 = vmatpush3.bf16.msra.mxu1 %v1529_v59  ;;  %v1845_v59 = vld [vmem:[%s1879_s4] sm:$0x77]  ;;  %s1732_s4 = smov [#allocation10]  }
  0x89   :  { %640 = vmatprep.subr.bf16.mxu0 %v1532_v60  ;;  %1338 = vmatprep.subr.bf16.mxu1 %v1563_v22  ;;  %v183_v60 = vsub.s32 4, %v1836_v45  ;;  %v1579_v22 = vld [vmem:[#allocation8] sm:$0xff]   ;;  %s1185_s19 = sshll.u32 %s1732_s4, 4  ;;  %s1186_s19 = int_to_ptr.vmem [resolvable:$true] %s1185_s19 }
  0x8a   :  { %s1691_s20 = scalar_lea.vmem %s1186_s19, 64  ;;  %p1696_p5 = scmp.lt.s32.totalorder %s1186_s19, %s1186_s19 }
  0x8b   :  { %632 = vmatmul.mubr.bf16.vlgmr.msra.gmra.mrb[0].mxu0 %v1811_v35  ;;  %1395 = vmatmul.mubr.bf16.vlgmr.msra.gmra.mrb[4].mxu1 %v1533_v62  ;;  %v1576_v35 = vld [vmem:[#allocation7 + $0x30] sm:$0xff]   ;;  %p1692_p4 = scmp.ne.s32.totalorder %s1186_s19, %s1691_s20  ;;  %p1697_p6 = scmp.lt.s32.totalorder %s1691_s20, %s1691_s20 }
  0x8c   :  { %641 = vmatpush1.bf16.msra.mxu0 %v1530_v61  ;;  %672 = vmatprep.mubr.bf16.mxu0 %v1731_v2  ;;  %v180_v61 = vrot.slane %v1845_v59, %v179_v46 }
  0x8d   :  { %642 = vmatprep.subr.bf16.mxu0 %v1536_v63  ;;  %1339 = vmatpush3.bf16.msra.mxu1 %v1564_v23  ;;  %v1580_v23 = vld [vmem:[#allocation8 + $0x8] sm:$0xff]   ;;  %p1698_p7 = por %p1697_p6, %p1696_p5 }
  0x8e   :  { %1340 = vmatprep.subr.bf16.mxu1 %v1565_v24  ;;  %v1581_v24 = vld [vmem:[#allocation8 + $0x10] sm:$0xff]  }
  0x8f   :  { %p1699_p8 = pnand %p1698_p7, %p1692_p4 }
  0x90   :  { %643 = vmatpush1.bf16.msra.mxu0 %v1534_v0  ;;  %v195_v0 = vrot.slane %v180_v61, %v179_v46 }
  0x91   :  { %644 = vmatprep.subr.bf16.mxu0 %v1539_v1  ;;  %1341 = vmatpush3.bf16.msra.mxu1 %v1566_v25  ;;  %v1582_v25 = vld [vmem:[#allocation8 + $0x18] sm:$0xff]  }
  0x92   :  { %1342 = vmatprep.subr.bf16.mxu1 %v1567_v26  ;;  %v1583_v26 = vld [vmem:[#allocation8 + $0x20] sm:$0xff]  }
  0x94   :  { %645 = vmatpush1.bf16.msra.mxu0 %v1537_v3 }
  0x95   :  { %646 = vmatprep.subr.bf16.mxu0 %v1542_v4  ;;  %1343 = vmatpush3.bf16.msra.mxu1 %v1568_v27  ;;  %v1584_v27 = vld [vmem:[#allocation8 + $0x28] sm:$0xff]  }
  0x96   :  { %1344 = vmatprep.subr.bf16.mxu1 %v1569_v28  ;;  %v1585_v28 = vld [vmem:[#allocation8 + $0x30] sm:$0xff]  }
  0x98   :  { %647 = vmatpush1.bf16.msra.mxu0 %v1540_v5 }
  0x99   :  { %648 = vmatprep.subr.bf16.mxu0 %v1545_v6  ;;  %1345 = vmatpush3.bf16.msra.mxu1 %v1570_v29  ;;  %v1586_v29 = vld [vmem:[#allocation8 + $0x38] sm:$0xff]  }
  0x9a   :  { %1346 = vmatprep.subr.bf16.mxu1 %v1571_v30 }
  0x9c   :  { %649 = vmatpush1.bf16.msra.mxu0 %v1543_v7 }
  0x9d   :  { %650 = vmatprep.subr.bf16.mxu0 %v1548_v8  ;;  %1347 = vmatpush3.bf16.msra.mxu1 %v1572_v31 }
  0x9e   :  { %1348 = vmatprep.subr.bf16.mxu1 %v1573_v32 }
  0xa0   :  { %651 = vmatpush1.bf16.msra.mxu0 %v1546_v9 }
  0xa1   :  { %652 = vmatprep.subr.bf16.mxu0 %v1551_v10  ;;  %1349 = vmatpush3.bf16.msra.mxu1 %v1574_v33 }
  0xa2   :  { %1350 = vmatprep.subr.bf16.mxu1 %v1575_v34  ;;  %v835_v34 = vsub.s32 1, %v1836_v45 }
  0xa4   :  { %653 = vmatpush1.bf16.msra.mxu0 %v1549_v11 }
  0xa5   :  { %654 = vmatprep.subr.bf16.mxu0 %v1554_v12  ;;  %1351 = vmatpush3.bf16.msra.mxu1 %v1576_v35 }
  0xa6   :  { %1352 = vmatprep.subr.bf16.mxu1 %v1577_v36  ;;  %v836_v36 = vrot.slane %v1845_v59, %v835_v34 }
  0xa8   :  { %655 = vmatpush1.bf16.msra.mxu0 %v1552_v13 }
  0xa9   :  { %1398 = vmatprep.subr.bf16.mxu0 %v1729_v39  ;;  %1353 = vmatpush3.bf16.msra.mxu1 %v1578_v37 }
  0xaa   :  { %1418 = vmatprep.subr.bf16.mxu1 %v1729_v39 }
  0xab   :  { %673 = vmatmul.mubr.bf16.vlgmr.msra.gmra.mrb[0].mxu0 %v1533_v62  ;;  %v184_v62 = vrot.slane %v1845_v59, %v183_v60 }
  0xac   :  { %1414 = vmatprep.mubr.msk.bf16.mxu0 %vm1730_vm0, %v1729_v39  ;;  %1399 = vmatpush3.bf16.msra.mxu0 %v1555_v14 }
  0xad   :  { %1400 = vmatprep.subr.bf16.mxu0 %v1729_v39  ;;  %v199_v2 = vrot.slane %v184_v62, %v179_v46 }
  0xb0   :  { %1401 = vmatpush3.bf16.msra.mxu0 %v1556_v15 }
  0xb1   :  { %1402 = vmatprep.subr.bf16.mxu0 %v1729_v39 }
  0xb4   :  { %1403 = vmatpush3.bf16.msra.mxu0 %v1557_v16 }
  0xb5   :  { %1404 = vmatprep.subr.bf16.mxu0 %v1729_v39 }
  0xb8   :  { %1405 = vmatpush3.bf16.msra.mxu0 %v1558_v17 }
  0xb9   :  { %1406 = vmatprep.subr.bf16.mxu0 %v1729_v39 }
  0xbc   :  { %1407 = vmatpush3.bf16.msra.mxu0 %v1559_v18 }
  0xbd   :  { %1408 = vmatprep.subr.bf16.mxu0 %v1729_v39 }
  0xc0   :  { %1409 = vmatpush3.bf16.msra.mxu0 %v1560_v19 }
  0xc1   :  { %1410 = vmatprep.subr.bf16.mxu0 %v1729_v39 }
  0xc4   :  { %1411 = vmatpush3.bf16.msra.mxu0 %v1561_v20 }
  0xc5   :  { %1412 = vmatprep.subr.bf16.mxu0 %v1729_v39 }
  0xc8   :  { %1413 = vmatpush3.bf16.msra.mxu0 %v1562_v21 }
 0x13e   :  { %v1323_v38 = vpop.f32.mrb[0].mxu1 }
 0x13f   :  { %v1324_v40 = vpop.f32.mrb[1].mxu1 }
 0x140   :  { %v1325_v41 = vadd.f32 %v1324_v40, %v1323_v38  ;;  %v1326_v42 = vpop.f32.mrb[2].mxu1 }
 0x141   :  { %v1327_v43 = vpop.f32.mrb[3].mxu1 }
 0x142   :  { %v716_v50 = vadd.f32 %v1325_v41, %v203_v49 }
 0x15e   :  { %v755_v51 = vpop.f32.mrb[4].mxu1 }
 0x15f   :  { %v756_v52 = vadd.f32 %v755_v51, %v716_v50  ;;  %v1396_v53 = vpop.f32.mrb[5].mxu1  ;;  %v1087_v50 = vsub.s32 2, %v1836_v45 }
 0x160   :  { %v758_v54 = vpop.f32.mrb[6].mxu1 }
 0x161   :  { %v1273_v55 = vmul.f32 -1.442695, %v756_v52  ;;  %v1397_v56 = vpop.f32.mrb[7].mxu1  ;;  %v1088_v51 = vrot.slane %v1845_v59, %v1087_v50 }
 0x163   :  { %1587 = vpow2.f32 %v1273_v55 }
 0x16d   :  { %v1588_v57 = vpop.eup %1587 }
 0x16e   :  { %v772_v58 = vadd.f32 1.0, %v1588_v57 }
 0x170   :  { %1589 = vrcp.f32 %v772_v58 }
 0x17a   :  { %v1590_v63 = vpop.eup %1589 }
 0x17b   :  { %v781_v1 = vmul.f32 %v1590_v63, %v756_v52 }
 0x17d   :  { %v784_v3 = vpack.c.bf16 %v781_v1, %v781_v1 }
 0x17e   :  { %v674_v4 = vpop.f32.mrb[0].mxu0 }
 0x17f   :  { %v1438_v5 = vadd.f32 %v674_v4, %v195_v0  ;;  %v676_v6 = vpop.f32.mrb[1].mxu0  ;;  %1415 = vmatmul.mubr.bf16.vlgmr.msra.gmra.mrb[4].mxu0 %v784_v3 }
 0x180   :  { %v1439_v7 = vadd.f32 %v676_v6, %v199_v2  ;;  %v678_v8 = vpop.f32.mrb[2].mxu0 }
 0x181   :  { %v1271_v9 = vmul.f32 -1.442695, %v1438_v5  ;;  %v679_v10 = vpop.f32.mrb[3].mxu0 }
 0x182   :  { %v1272_v11 = vmul.f32 -1.442695, %v1439_v7 }
 0x183   :  { %1591 = vpow2.f32 %v1271_v9 }
 0x184   :  { %1593 = vpow2.f32 %v1272_v11 }
 0x18d   :  { %v1592_v12 = vpop.eup %1591 }
 0x18e   :  { %v1594_v13 = vpop.eup %1593  ;;  %v770_v14 = vadd.f32 1.0, %v1592_v12 }
 0x18f   :  { %v771_v15 = vadd.f32 1.0, %v1594_v13 }
 0x190   :  { %1595 = vrcp.f32 %v770_v14 }
 0x191   :  { %1597 = vrcp.f32 %v771_v15 }
 0x19a   :  { %v1596_v16 = vpop.eup %1595 }
 0x19b   :  { %v1598_v17 = vpop.eup %1597  ;;  %v779_v18 = vmul.f32 %v1596_v16, %v1438_v5 }
 0x19c   :  { %v780_v19 = vmul.f32 %v1598_v17, %v1439_v7 }
 0x19d   :  { %v782_v21 = vpack.c.bf16 %v779_v18, %v779_v18 }
 0x19e   :  { %v783_v20 = vpack.c.bf16 %v780_v19, %v780_v19 }
 0x1a0   :  { %1013 = vmatprep.mubr.bf16.mxu1 %v783_v20 }
 0x1a1   :  { %1014 = vmatmul.mubr.bf16.vlgmr.msra.gmra.mrb[8].mxu1 %v782_v21 }
 0x1a2   :  { %1434 = vmatprep.mubr.msk.bf16.mxu1 %vm1730_vm0, %v1729_v39  ;;  %1419 = vmatpush3.bf16.msra.mxu1 %v1579_v22 }
 0x1a3   :  { %1420 = vmatprep.subr.bf16.mxu1 %v1729_v39 }
 0x1a6   :  { %1421 = vmatpush3.bf16.msra.mxu1 %v1580_v23 }
 0x1a7   :  { %1422 = vmatprep.subr.bf16.mxu1 %v1729_v39 }
 0x1aa   :  { %1423 = vmatpush3.bf16.msra.mxu1 %v1581_v24 }
 0x1ab   :  { %1424 = vmatprep.subr.bf16.mxu1 %v1729_v39 }
 0x1ae   :  { %1425 = vmatpush3.bf16.msra.mxu1 %v1582_v25 }
 0x1af   :  { %1426 = vmatprep.subr.bf16.mxu1 %v1729_v39 }
 0x1b2   :  { %1427 = vmatpush3.bf16.msra.mxu1 %v1583_v26 }
 0x1b3   :  { %1428 = vmatprep.subr.bf16.mxu1 %v1729_v39 }
 0x1b6   :  { %1429 = vmatpush3.bf16.msra.mxu1 %v1584_v27 }
 0x1b7   :  { %1430 = vmatprep.subr.bf16.mxu1 %v1729_v39 }
 0x1ba   :  { %1431 = vmatpush3.bf16.msra.mxu1 %v1585_v28 }
 0x1bb   :  { %1432 = vmatprep.subr.bf16.mxu1 %v1729_v39 }
 0x1be   :  { %1433 = vmatpush3.bf16.msra.mxu1 %v1586_v29 }
 0x252   :  { %v1055_v30 = vpop.f32.mrb[4].mxu0 }
 0x253   :  { %v1416_v31 = vpop.f32.mrb[5].mxu0 }
 0x254   :  { %v1058_v32 = vpop.f32.mrb[6].mxu0 }
 0x255   :  { %v1417_v33 = vpop.f32.mrb[7].mxu0 }
 0x274   :  { %v1354_v35 = vpop.f32.mrb[8].mxu1 }
 0x275   :  { %v1355_v37 = vpop.f32.mrb[9].mxu1 }
 0x276   :  { %v1356_v38 = vadd.f32 %v1355_v37, %v1354_v35  ;;  %v1357_v40 = vpop.f32.mrb[10].mxu1 }
 0x277   :  { %v1358_v41 = vpop.f32.mrb[11].mxu1 }
 0x278   :  { %v1016_v42 = vadd.f32 %v1356_v38, %v836_v36 }
 0x27a   :  { %v1056_v43 = vadd.f32 %v1055_v30, %v1016_v42 }
 0x27c   :  { %v1298_v44 = vmul.f32 -1.442695, %v1056_v43 }
 0x27e   :  { %1599 = vpow2.f32 %v1298_v44 }
 0x288   :  { %v1600_v39 = vpop.eup %1599 }
 0x289   :  { %v1064_v46 = vadd.f32 1.0, %v1600_v39 }
 0x28b   :  { %1601 = vrcp.f32 %v1064_v46 }
 0x295   :  { %v1602_v47 = vpop.eup %1601 }
 0x296   :  { %v1067_v48 = vmul.f32 %v1602_v47, %v1056_v43 }
 0x298   :  { %v1068_v49 = vpack.c.bf16 %v1067_v48, %v1067_v48 }
 0x29a   :  { %1435 = vmatmul.mubr.bf16.vlgmr.msra.gmra.mrb[12].mxu1 %v1068_v49 }
 0x36d   :  { %v1171_v52 = vpop.f32.mrb[12].mxu1 }
 0x36e   :  { %v1172_v53 = vadd.f32 %v1171_v52, %v1088_v51  ;;  %v1436_v54 = vpop.f32.mrb[13].mxu1 }
 0x36f   :  { %v1174_v55 = vpop.f32.mrb[14].mxu1 }
 0x370   :  { %v1177_v56 = vpack.c.bf16 %v1172_v53, %v1172_v53  ;;  %v1437_v57 = vpop.f32.mrb[15].mxu1 }
 0x372   :  { %1178 = vst [vmem:[#allocation10] sm:$0xf] %v1177_v56 }
 0x373   :  { %1702 = shalt.err (!%p1699_p8)
}
 0x374   :  { %s1703_s23 = scalar_lea.hbm %s1880_s5, 64 }
 0x375   :  { %p1704_p9 = scmp.ne.s32.totalorder %s1880_s5, %s1703_s23  ;;  %p1707_p10 = scmp.lt.u32.totalorder %s1703_s23, %s1880_s5 }
 0x377   :  { %p1709_p11 = pnand %p1707_p10, %p1704_p9 }
 0x379   :  { %1712 = shalt.err (!%p1709_p11)
}
 0x37a   :  { %1188 = dma.vmem_to_hbm [thread:$0]  %s1186_s19, 64, %s1880_s5, [#allocation4]  }
 0x37b   :  { %1719 = dma.done.wait [#allocation4], 64  }
 0x37c   :  { %1720 = vsyncadd [#allocation4], 4294967232 }
 0x37d   :  { %1192 = vsyncpa [#allocation3], 1 }
 0x37e   :  { %1193 = vsyncpa [#allocation6], 1 }
 0x37f   :  { %1194 = vsyncpa [#allocation9], 1 }
 0x380   :  { %1195 = vsyncpa [#allocation4], 1 }

</bundles_post_ra>
